<compile_context>
chip_gen: v7x
topology: tpu7x:2x2x1
jax: 0.10.0
libtpu: 0.0.40
codegen_flags: <defaults>
</compile_context>

<pallas_src>
import jax
import jax.numpy as jnp
from jax import lax
from jax.experimental import pallas as pl
from jax.experimental.pallas import tpu as pltpu

# ---- model dims (cmd_args.anion_latent_dim / cation_latent_dim chosen small) ----
ANION_LATENT_DIM = 32
CATION_LATENT_DIM = 32
IN_DIM = ANION_LATENT_DIM + CATION_LATENT_DIM   # 64
H1_DIM = ANION_LATENT_DIM                       # 32
H2_DIM = 30
H2_PAD = 32                                     # padded hidden-2 (zero-filled)
OUT_DIM = 5
OUT_PAD = 8                                     # padded output (zero rows, sliced off)

# Per-step VMEM @ tb=16384 (f32): x dbuf 8 MiB + outT dbuf 1 MiB + h1/h2 ~4 MiB
# + weights (tiny)  ->  well under the 32 MiB limit set below on all generations.
TILE_B_MAX = 16384


def _round_up(n, m):
    return ((n + m - 1) // m) * m


def _choose_tile(batch, tile_b):
    # Small batches: one full-extent block (block == array dims is always legal).
    if batch <= 256:
        return batch
    # Split into >=2 blocks (v7x megacore), lane-aligned (multiple of 128) so the
    # transposed output block (OUT_PAD, tb) is lane-dense and unmasked.
    return min(tile_b, _round_up(pl.cdiv(batch, 2), 128))


def ztransfer_mlp_kernel(x_ref, w1_ref, b1_ref, w2_ref, b2_ref, w3t_ref, b3t_ref, ot_ref):
    cdt = w1_ref.dtype  # MXU operand dtype (f32 by default; bf16 optional)

    # In-kernel cast of the streamed f32 tile (free VPU work under the DMA pipeline).
    x = x_ref[...].astype(cdt)

    # Layer 1: Linear + Tanh  (f32 accumulation, f32 bias/tanh -> safe on v5e's f32 VPU/EUP)
    h1 = jnp.tanh(
        jnp.dot(x, w1_ref[...], preferred_element_type=jnp.float32) + b1_ref[...]
    )
    # Layer 2: Linear + Tanh  (hidden dim padded 30 -> 32 with zero weights)
    h2 = jnp.tanh(
        jnp.dot(h1.astype(cdt), w2_ref[...], preferred_element_type=jnp.float32)
        + b2_ref[...]
    )
    # Layer 3: Linear, computed directly in TRANSPOSED form:
    #   out_t[o, b] = sum_k w3t[o, k] * h2[b, k]   ->  (OUT_PAD, tb)
    out_t = lax.dot_general(
        w3t_ref[...], h2.astype(cdt),
        dimension_numbers=(((1,), (1,)), ((), ())),
        preferred_element_type=jnp.float32,
    ) + b3t_ref[...]

    ot_ref[...] = out_t.astype(ot_ref.dtype)   # lane-dense, unmasked vst


def ztransfer_mlp(x, params, *, compute_dtype=jnp.float32, tile_b=TILE_B_MAX):
    """x: [B, IN_DIM] float32. params: transposed weights [in, out], biases [1, out].

    Returns [B, OUT_DIM] float32 matching the PyTorch module's forward.
    """
    B, d = x.shape
    assert d == IN_DIM
    cdt = compute_dtype

    # ---- wrapper-side layout prep (tiny tensors, one-time cost) ----
    w1 = params["w1"].astype(cdt)                                             # [64, 32]
    w2 = jnp.zeros((H1_DIM, H2_PAD), cdt).at[:, :H2_DIM].set(                 # [32, 32]
        params["w2"].astype(cdt))
    w3t = jnp.zeros((OUT_PAD, H2_PAD), cdt).at[:OUT_DIM, :H2_DIM].set(        # [8, 32]
        params["w3"].astype(cdt).T)
    b1 = params["b1"].reshape(1, H1_DIM).astype(jnp.float32)                  # [1, 32]
    b2 = jnp.zeros((1, H2_PAD), jnp.float32).at[:, :H2_DIM].set(              # [1, 32]
        params["b2"].reshape(1, H2_DIM).astype(jnp.float32))
    b3t = jnp.zeros((OUT_PAD, 1), jnp.float32).at[:OUT_DIM, 0].set(           # [8, 1]
        params["b3"].reshape(OUT_DIM).astype(jnp.float32))

    # ---- batch tiling: no pad / no cast of x; boundary blocks handle ragged B ----
    tb = _choose_tile(B, tile_b)
    grid = (pl.cdiv(B, tb),)

    def const_spec(shape):
        # Same block every step -> stays VMEM-resident across the whole grid.
        return pl.BlockSpec(shape, lambda i: (0,) * len(shape))

    cost = pl.CostEstimate(
        flops=2 * B * (IN_DIM * H1_DIM + H1_DIM * H2_PAD + H2_PAD * OUT_PAD),
        transcendentals=B * (H1_DIM + H2_PAD),
        bytes_accessed=B * IN_DIM * 4 + OUT_PAD * B * 4,
    )

    out_t = pl.pallas_call(
        ztransfer_mlp_kernel,
        out_shape=jax.ShapeDtypeStruct((OUT_PAD, B), jnp.float32),
        grid=grid,
        in_specs=[
            pl.BlockSpec((tb, IN_DIM), lambda i: (i, 0)),   # x tile, f32 straight from HBM
            const_spec(w1.shape), const_spec(b1.shape),
            const_spec(w2.shape), const_spec(b2.shape),
            const_spec(w3t.shape), const_spec(b3t.shape),
        ],
        # Transposed, lane-dense output block: (OUT_PAD, tb) with batch on lanes.
        out_specs=pl.BlockSpec((OUT_PAD, tb), lambda i: (0, i)),
        compiler_params=pltpu.CompilerParams(
            dimension_semantics=("parallel",),   # batch axis -> megacore sharding on v7x
            vmem_limit_bytes=32 << 20,           # <= physical VMEM on v5e/v6e/v7x
        ),
        cost_estimate=cost,
    )(x, w1, b1, w2, b2, w3t, b3t)

    # Tiny [OUT_PAD, B] -> [B, OUT_DIM] fixup (output bytes are a small fraction of x).
    return out_t[:OUT_DIM, :].T


def init_params(key):
    """Mirror the PyTorch init: weights ~ N(0, 0.1); biases = 0.
    Stored transposed ([in, out]); biases as [1, out]."""
    k1, k2, k3 = jax.random.split(key, 3)
    std = 0.1
    # PyTorch Linear weight is (out, in); generate that shape then transpose.
    w1 = (jax.random.normal(k1, (H1_DIM, IN_DIM), jnp.float32) * std).T
    w2 = (jax.random.normal(k2, (H2_DIM, H1_DIM), jnp.float32) * std).T
    w3 = (jax.random.normal(k3, (OUT_DIM, H2_DIM), jnp.float32) * std).T
    b1 = jnp.zeros((1, H1_DIM), jnp.float32)
    b2 = jnp.zeros((1, H2_DIM), jnp.float32)
    b3 = jnp.zeros((1, OUT_DIM), jnp.float32)
    return {"w1": w1, "b1": b1, "w2": w2, "b2": b2, "w3": w3, "b3": b3}


def reference_mlp(x, params):
    h1 = jnp.tanh(x @ params["w1"] + params["b1"])
    h2 = jnp.tanh(h1 @ params["w2"] + params["b2"])
    return h2 @ params["w3"] + params["b3"]


if __name__ == "__main__":
    key = jax.random.PRNGKey(0)
    kx, kp = jax.random.split(key)

    params = init_params(kp)

    # --- small batch (single full-extent block) ---
    batch = 8
    x = jax.random.normal(kx, (batch, IN_DIM), jnp.float32)
    ref = reference_mlp(x, params)

    out_f32 = jax.block_until_ready(ztransfer_mlp(x, params))
    assert out_f32.shape == (batch, OUT_DIM)
    assert jnp.allclose(out_f32, ref, atol=1e-5, rtol=1e-5), "f32 mismatch vs reference"

    # Optional bf16 MXU-operand path (in-kernel cast, f32 accumulation).
    out_bf16 = jax.block_until_ready(ztransfer_mlp(x, params, compute_dtype=jnp.bfloat16))
    assert out_bf16.shape == (batch, OUT_DIM)
    assert jnp.allclose(out_bf16, ref, atol=5e-2, rtol=5e-2), "bf16 mismatch vs reference"

    # --- ragged batch exercising the multi-block grid + boundary (partial tail) block ---
    batch2 = 300   # -> tb=256, grid=(2,), tail block has 44 valid rows
    x2 = jax.random.normal(kx, (batch2, IN_DIM), jnp.float32)
    out2 = jax.block_until_ready(ztransfer_mlp(x2, params))
    ref2 = reference_mlp(x2, params)
    assert out2.shape == (batch2, OUT_DIM)
    assert jnp.allclose(out2, ref2, atol=1e-5, rtol=1e-5), "tiled/boundary-path mismatch"

    print("KERNEL_OK")
</pallas_src>

<mosaic_0001>
module attributes {stable_mosaic.version = 11 : i64} {
  func.func @ztransfer_mlp_kernel(%arg0: i32, %arg1: memref<8x64xf32, #tpu.memory_space<vmem>>, %arg2: memref<64x32xf32, #tpu.memory_space<vmem>>, %arg3: memref<1x32xf32, #tpu.memory_space<vmem>>, %arg4: memref<32x32xf32, #tpu.memory_space<vmem>>, %arg5: memref<1x32xf32, #tpu.memory_space<vmem>>, %arg6: memref<8x32xf32, #tpu.memory_space<vmem>>, %arg7: memref<8x1xf32, #tpu.memory_space<vmem>>, %arg8: memref<8x8xf32, #tpu.memory_space<vmem>>) attributes {dimension_semantics = [#tpu.dimension_semantics<parallel>], iteration_bounds = array<i64: 1>, scalar_prefetch = 0 : i64, scratch_operands = 0 : i64, tpu.core_type = #tpu.core_type<tc>, window_params = [{transform_indices = @transform_0, window_bounds = array<i64: 8, 64>}, {pipeline_mode = #tpu.pipeline_mode<synchronous>, transform_indices = @transform_1, window_bounds = array<i64: 64, 32>}, {pipeline_mode = #tpu.pipeline_mode<synchronous>, transform_indices = @transform_2, window_bounds = array<i64: 1, 32>}, {pipeline_mode = #tpu.pipeline_mode<synchronous>, transform_indices = @transform_3, window_bounds = array<i64: 32, 32>}, {pipeline_mode = #tpu.pipeline_mode<synchronous>, transform_indices = @transform_4, window_bounds = array<i64: 1, 32>}, {pipeline_mode = #tpu.pipeline_mode<synchronous>, transform_indices = @transform_5, window_bounds = array<i64: 8, 32>}, {pipeline_mode = #tpu.pipeline_mode<synchronous>, transform_indices = @transform_6, window_bounds = array<i64: 8, 1>}, {transform_indices = @transform_7, window_bounds = array<i64: 8, 8>}]} {
    %c0 = arith.constant 0 : index
    %c0_0 = arith.constant 0 : index
    %0 = vector.load %arg1[%c0, %c0_0] : memref<8x64xf32, #tpu.memory_space<vmem>>, vector<8x64xf32>
    %c0_1 = arith.constant 0 : index
    %c0_2 = arith.constant 0 : index
    %1 = vector.load %arg2[%c0_1, %c0_2] : memref<64x32xf32, #tpu.memory_space<vmem>>, vector<64x32xf32>
    %cst = arith.constant dense<0.000000e+00> : vector<8x32xf32>
    %2 = tpu.matmul %0, %1, %cst {dimension_numbers = #tpu.dot_dimension_numbers<[1], [0], [0], [1], [0, 0, 1, 1], [], []>} : vector<8x64xf32>, vector<64x32xf32>, vector<8x32xf32> -> vector<8x32xf32>
    %c0_3 = arith.constant 0 : index
    %c0_4 = arith.constant 0 : index
    %3 = vector.load %arg3[%c0_3, %c0_4] : memref<1x32xf32, #tpu.memory_space<vmem>>, vector<1x32xf32>
    %4 = vector.broadcast %3 : vector<1x32xf32> to vector<8x32xf32>
    %5 = arith.addf %2, %4 : vector<8x32xf32>
    %6 = math.tanh %5 : vector<8x32xf32>
    %c0_5 = arith.constant 0 : index
    %c0_6 = arith.constant 0 : index
    %7 = vector.load %arg4[%c0_5, %c0_6] : memref<32x32xf32, #tpu.memory_space<vmem>>, vector<32x32xf32>
    %cst_7 = arith.constant dense<0.000000e+00> : vector<8x32xf32>
    %8 = tpu.matmul %6, %7, %cst_7 {dimension_numbers = #tpu.dot_dimension_numbers<[1], [0], [0], [1], [0, 0, 1, 1], [], []>} : vector<8x32xf32>, vector<32x32xf32>, vector<8x32xf32> -> vector<8x32xf32>
    %c0_8 = arith.constant 0 : index
    %c0_9 = arith.constant 0 : index
    %9 = vector.load %arg5[%c0_8, %c0_9] : memref<1x32xf32, #tpu.memory_space<vmem>>, vector<1x32xf32>
    %10 = vector.broadcast %9 : vector<1x32xf32> to vector<8x32xf32>
    %11 = arith.addf %8, %10 : vector<8x32xf32>
    %12 = math.tanh %11 : vector<8x32xf32>
    %c0_10 = arith.constant 0 : index
    %c0_11 = arith.constant 0 : index
    %13 = vector.load %arg6[%c0_10, %c0_11] : memref<8x32xf32, #tpu.memory_space<vmem>>, vector<8x32xf32>
    %cst_12 = arith.constant dense<0.000000e+00> : vector<8x8xf32>
    %14 = tpu.matmul %13, %12, %cst_12 {dimension_numbers = #tpu.dot_dimension_numbers<[1], [1], [0], [0], [0, 0, 1, 0], [], []>} : vector<8x32xf32>, vector<8x32xf32>, vector<8x8xf32> -> vector<8x8xf32>
    %c0_13 = arith.constant 0 : index
    %c0_14 = arith.constant 0 : index
    %15 = vector.load %arg7[%c0_13, %c0_14] : memref<8x1xf32, #tpu.memory_space<vmem>>, vector<8x1xf32>
    %16 = vector.broadcast %15 : vector<8x1xf32> to vector<8x8xf32>
    %17 = arith.addf %14, %16 : vector<8x8xf32>
    %c0_15 = arith.constant 0 : index
    %c0_16 = arith.constant 0 : index
    %18 = vector.load %arg8[%c0_15, %c0_16] : memref<8x8xf32, #tpu.memory_space<vmem>>, vector<8x8xf32>
    tpu.vector_store %arg8[%c0_15, %c0_16], %17 {strides = array<i32>} : memref<8x8xf32, #tpu.memory_space<vmem>>, vector<8x8xf32>,
    return
  }
  func.func @transform_0(%arg0: i32) -> (i32, i32) {
    %c0_i32 = arith.constant 0 : i32
    %c0_i32_0 = arith.constant 0 : i32
    return %arg0, %c0_i32 : i32, i32
  }
  func.func @transform_1(%arg0: i32) -> (i32, i32) {
    %c0_i32 = arith.constant 0 : i32
    %c0_i32_0 = arith.constant 0 : i32
    %c0_i32_1 = arith.constant 0 : i32
    return %c0_i32, %c0_i32_0 : i32, i32
  }
  func.func @transform_2(%arg0: i32) -> (i32, i32) {
    %c0_i32 = arith.constant 0 : i32
    %c0_i32_0 = arith.constant 0 : i32
    %c0_i32_1 = arith.constant 0 : i32
    return %c0_i32, %c0_i32_0 : i32, i32
  }
  func.func @transform_3(%arg0: i32) -> (i32, i32) {
    %c0_i32 = arith.constant 0 : i32
    %c0_i32_0 = arith.constant 0 : i32
    %c0_i32_1 = arith.constant 0 : i32
    return %c0_i32, %c0_i32_0 : i32, i32
  }
  func.func @transform_4(%arg0: i32) -> (i32, i32) {
    %c0_i32 = arith.constant 0 : i32
    %c0_i32_0 = arith.constant 0 : i32
    %c0_i32_1 = arith.constant 0 : i32
    return %c0_i32, %c0_i32_0 : i32, i32
  }
  func.func @transform_5(%arg0: i32) -> (i32, i32) {
    %c0_i32 = arith.constant 0 : i32
    %c0_i32_0 = arith.constant 0 : i32
    %c0_i32_1 = arith.constant 0 : i32
    return %c0_i32, %c0_i32_0 : i32, i32
  }
  func.func @transform_6(%arg0: i32) -> (i32, i32) {
    %c0_i32 = arith.constant 0 : i32
    %c0_i32_0 = arith.constant 0 : i32
    %c0_i32_1 = arith.constant 0 : i32
    return %c0_i32, %c0_i32_0 : i32, i32
  }
  func.func @transform_7(%arg0: i32) -> (i32, i32) {
    %c0_i32 = arith.constant 0 : i32
    %c0_i32_0 = arith.constant 0 : i32
    return %c0_i32, %arg0 : i32, i32
  }
}

</mosaic_0001>

<bundles_post_ra>
// kernel: tpu_custom_call.1
= control target key start
LH: loop header
LB: loop body
LE: loop exit
PB: predicated region body
PF: predicated region fallthrough
CT: control target
= control target key end

     0   :  { %v412_v3 = vmov 0.0|0.0   ;;  %vm413_vm0 = vmmov 0   ;;  %v414_v6 = vmov 0.0   ;;  %s526_s0 = inlined_call_operand.vmem [shape: f32[8,64], index: 0, kind: input, shape index: {}]   ;;  %s527_s1 = inlined_call_operand.vmem [shape: f32[64,32], index: 1, kind: input, shape index: {}]   ;;  %s528_s2 = inlined_call_operand.vmem [shape: f32[1,32], index: 2, kind: input, shape index: {}]   ;;  %s529_s3 = inlined_call_operand.vmem [shape: f32[32,32], index: 3, kind: input, shape index: {}]   ;;  %s530_s4 = inlined_call_operand.vmem [shape: f32[1,32], index: 4, kind: input, shape index: {}]   ;;  %s531_s5 = inlined_call_operand.vmem [shape: f32[8,32], index: 5, kind: input, shape index: {}]   ;;  %s532_s6 = inlined_call_operand.vmem [shape: f32[8,1], index: 6, kind: input, shape index: {}]   ;;  %s533_s7 = inlined_call_operand.hbm [shape: f32[8,8], index: 7, kind: output, shape index: {}]  }
   0x1   :  { %v28_v0 = vld [vmem:[%s527_s1] sm:$0xff]  ;;  %v29_v1 = vld [vmem:[%s527_s1 + $0x8] sm:$0xff]  ;;  %v30_v2 = vld [vmem:[%s527_s1 + $0x10] sm:$0xff]  ;;  %360 = vmatprep.subr.bf16.mxu0 %v412_v3  ;;  %341 = vmatprep.mubr.msk.f32.mxu0 %vm413_vm0, %v414_v6 }
   0x2   :  { %v361_v4 = vpack.c.bf16 %v29_v1, %v28_v0  ;;  %v31_v5 = vld [vmem:[%s527_s1 + $0x18] sm:$0xff]  ;;  %372 = vmatprep.subr.bf16.mxu1 %v412_v3  ;;  %352 = vmatprep.mubr.msk.f32.mxu1 %vm413_vm0, %v414_v6 }
   0x3   :  { %v364_v7 = vpack.c.bf16 %v31_v5, %v30_v2 }
   0x4   :  { %362 = vmatpush3.bf16.msra.mxu0 %v361_v4 }
   0x5   :  { %12 = vsyncpa [#allocation3], 0  ;;  %363 = vmatprep.subr.bf16.mxu0 %v412_v3  ;;  %v32_v8 = vld [vmem:[%s527_s1 + $0x20] sm:$0xff]  ;;  %v33_v9 = vld [vmem:[%s527_s1 + $0x28] sm:$0xff]  ;;  %vm43_vm1 = vcmask 523264   ;;  %vm129_vm2 = vcmask 261120  }
   0x6   :  { %v367_v10 = vpack.c.bf16 %v33_v9, %v32_v8  ;;  %v34_v11 = vld [vmem:[%s527_s1 + $0x30] sm:$0xff]  ;;  %v35_v12 = vld [vmem:[%s527_s1 + $0x38] sm:$0xff]  ;;  %v27_v14 = vld [vmem:[%s526_s0] sm:$0xff]  ;;  %v415_v27 = vmov 0   ;;  %vm287_vm3 = vcmask 64512  }
   0x7   :  { %v370_v13 = vpack.c.bf16 %v35_v12, %v34_v11  ;;  %v118_v15 = vld [vmem:[%s529_s3] sm:$0xff]  ;;  %v119_v16 = vld [vmem:[%s529_s3 + $0x8] sm:$0xff]  ;;  %v120_v17 = vld [vmem:[%s529_s3 + $0x10] sm:$0xff]  ;;  %383 = vset.pattern.permute.xlu0 %v415_v27 }
   0x8   :  { %365 = vmatpush3.bf16.msra.mxu0 %v364_v7  ;;  %v373_v18 = vpack.c.bf16 %v119_v16, %v118_v15  ;;  %v121_v19 = vld [vmem:[%s529_s3 + $0x18] sm:$0xff]  ;;  %v303_v21 = vld [vmem:[%s528_s2] ss:$0 sm:$0xff] }
   0x9   :  { %366 = vmatprep.subr.bf16.mxu0 %v412_v3  ;;  %v376_v20 = vpack.c.bf16 %v121_v19, %v120_v17  ;;  %v205_v26 = vld [vmem:[%s532_s6] sm:$0xff]  ;;  %s416_s6 = smov [#allocation2]  }
   0xa   :  { %374 = vmatpush3.bf16.msra.mxu1 %v373_v18  ;;  %208 = vperm.xlu0 %383, %v205_v26   ;;  %v305_v28 = vld [vmem:[%s530_s4] ss:$0 sm:$0xff]  ;;  %s295_s8 = sshll.u32 %s416_s6, 4  ;;  %s296_s8 = int_to_ptr.vmem [resolvable:$true] %s295_s8 }
   0xb   :  { %375 = vmatprep.subr.bf16.mxu1 %v412_v3  ;;  %v204_v33 = vld [vmem:[%s531_s5] sm:$0xff]  ;;  %s388_s4 = scalar_lea.vmem %s296_s8, 128  ;;  %p393_p1 = scmp.lt.s32.totalorder %s296_s8, %s296_s8 }
   0xc   :  { %368 = vmatpush3.bf16.msra.mxu0 %v367_v10  ;;  %p389_p0 = scmp.ne.s32.totalorder %s296_s8, %s388_s4  ;;  %p394_p2 = scmp.lt.s32.totalorder %s388_s4, %s388_s4 }
   0xd   :  { %369 = vmatprep.subr.bf16.mxu0 %v412_v3 }
   0xe   :  { %377 = vmatpush3.bf16.msra.mxu1 %v376_v20  ;;  %p395_p3 = por %p394_p2, %p393_p1 }
   0xf   :  { %355 = vmatprep.subr.mxu1 %v414_v6 }
  0x10   :  { %371 = vmatpush3.bf16.msra.mxu0 %v370_v13  ;;  %p396_p4 = pnand %p395_p3, %p389_p0 }
  0x13   :  { %342 = vmatmul.mubr.msk.f32.vlgmr.msra.gmra.mrb[0].mxu0 %vm43_vm1, %v27_v14 }
  0x89   :  { %v209_v34 = vpop.permute.xlu0 %208 }
  0xe6   :  { %v113_v22 = vpop.f32.mrb[0].mxu0 }
  0xe7   :  { %v114_v23 = vadd.f32 %v303_v21, %v113_v22  ;;  %v343_v24 = vpop.f32.mrb[1].mxu0 }
  0xe9   :  { %384 = vtanh.f32 %v114_v23 }
  0xf3   :  { %v385_v25 = vpop.eup %384 }
  0xf4   :  { %353 = vmatmul.mubr.msk.f32.vlgmr.msra.gmra.mrb[0].mxu1 %vm129_vm2, %v385_v25 }
  0xf5   :  { %357 = vmatprep.mubr.msk.f32.mxu1 %vm413_vm0, %v414_v6 }
 0x1c7   :  { %v199_v29 = vpop.f32.mrb[0].mxu1 }
 0x1c8   :  { %v200_v30 = vadd.f32 %v305_v28, %v199_v29  ;;  %v354_v31 = vpop.f32.mrb[1].mxu1 }
 0x1ca   :  { %386 = vtanh.f32 %v200_v30 }
 0x1d4   :  { %v387_v32 = vpop.eup %386 }
 0x1d5   :  { %356 = vmatpush3.xpose.msk.msra.mxu1 %vm129_vm2, %v387_v32 }
 0x1d8   :  { %358 = vmatmul.mubr.msk.f32.vlgmr.msra.gmra.mrb[2].mxu1 %vm129_vm2, %v204_v33 }
 0x2ab   :  { %v283_v35 = vpop.f32.mrb[2].mxu1 }
 0x2ac   :  { %v284_v36 = vadd.f32 %v283_v35, %v209_v34  ;;  %v359_v37 = vpop.f32.mrb[3].mxu1 }
 0x2ae   :  { %288 = vst.msk [vmem:[#allocation2] sm:$0xff] %vm287_vm3, %v284_v36 }
 0x2af   :  { %399 = shalt.err (!%p396_p4)
}
 0x2b0   :  { %s400_s10 = scalar_lea.hbm %s533_s7, 128 }
 0x2b1   :  { %p401_p5 = scmp.ne.s32.totalorder %s533_s7, %s400_s10  ;;  %p404_p6 = scmp.lt.u32.totalorder %s400_s10, %s533_s7 }
 0x2b3   :  { %p406_p7 = pnand %p404_p6, %p401_p5 }
 0x2b5   :  { %409 = shalt.err (!%p406_p7)
}
 0x2b6   :  { %298 = dma.vmem_to_hbm [thread:$0]  %s296_s8, 128, %s533_s7, [#allocation3]  }
 0x2b7   :  { %410 = dma.done.wait [#allocation3], 128  }
 0x2b8   :  { %411 = vsyncadd [#allocation3], 4294967168 }
 0x2b9   :  { %302 = vsyncpa [#allocation3], 1 }

</bundles_post_ra>
